<compile_context>
chip_gen: v6e
topology: v6e:2x2x1
jax: 0.10.0
libtpu: 0.0.40
codegen_flags: <defaults>
</compile_context>

<pallas_src>
import functools

import jax
import jax.numpy as jnp
from jax.experimental import pallas as pl
from jax.experimental.pallas import tpu as pltpu


def _round_up(x, m):
    return (x + m - 1) // m * m


def textcnn_kernel(emb_ref, wc_ref, bc_ref, lim_ref, fcw_ref, fcb_ref, out_ref,
                   *, kmax, l_pad):
    emb = emb_ref[...]                                   # (TB, S_pad, E) bf16
    tb, _, e = emb.shape

    # im2col unfold: X[b, t, j*E:(j+1)*E] = emb[b, t+j, :]
    x_unf = jnp.concatenate(
        [emb[:, j:j + l_pad, :] for j in range(kmax)], axis=-1)   # (TB, L, kmax*E)
    x2 = x_unf.reshape(tb * l_pad, kmax * e)             # (TB*L, kmax*E) -> MXU M>=128

    # all filter sizes fused into one MXU matmul (weights zero-padded to kmax taps)
    h = jnp.dot(x2, wc_ref[...], preferred_element_type=jnp.float32)   # (TB*L, NF_pad)
    h = jnp.maximum(h + bc_ref[...], 0.0)                # conv bias + ReLU
    h = h.reshape(tb, l_pad, -1)                         # (TB, L, NF_pad)

    # mask positions past each filter's valid conv length (0 is neutral after ReLU)
    t_idx = jax.lax.broadcasted_iota(jnp.int32, h.shape, 1)
    h = jnp.where(t_idx < lim_ref[...][None, :, :], h, 0.0)

    pooled = jnp.max(h, axis=1)                          # max_pool1d over time -> (TB, NF_pad)
    # dropout: identity at inference
    logits = jnp.dot(pooled.astype(fcw_ref.dtype), fcw_ref[...],
                     preferred_element_type=jnp.float32) + fcb_ref[...]
    out_ref[...] = logits                                # (TB, C_pad) lane-dense store


def textcnn_forward(x, params, *, tb=8):
    """x mirrors the PyTorch forward: x[0] are the token ids, shape (B, S)."""
    ids = x[0]
    emb_table = params["embedding"]                      # (V, E)
    conv_ws = params["conv_ws"]                          # list of (k, E, F)
    conv_bs = params["conv_bs"]                          # list of (1, F)
    fc_w = params["fc_w"]                                # (F * nk, C)
    fc_b = params["fc_b"]                                # (1, C)

    B, S = ids.shape
    E = int(emb_table.shape[1])
    ks = [int(w.shape[0]) for w in conv_ws]
    kmax = max(ks)
    F = int(conv_ws[0].shape[2])
    nk = len(conv_ws)
    C = int(fc_w.shape[1])

    LANE, SUB = 128, 8
    l_pad = _round_up(S, SUB)                            # pooled positions, sublane aligned
    s_pad = _round_up(l_pad + kmax - 1, SUB)             # padded input time length
    nf_pad = _round_up(nk * F, LANE)                     # conv channels, lane dense
    c_pad = _round_up(C, LANE)                           # logits, lane dense
    b_pad = _round_up(B, tb)

    # glue: embedding gather (out = self.embedding(x[0])), bf16 halves HBM traffic
    # TODO(synk): move the gather in-kernel via scalar-prefetch DMA to avoid the (B,S,E) HBM round trip.
    emb = jnp.take(emb_table, ids, axis=0).astype(jnp.bfloat16)          # (B, S, E)
    emb = jnp.pad(emb, ((0, b_pad - B), (0, s_pad - S), (0, 0)))

    # fuse all conv weights into one (kmax*E, nf_pad) matrix (zero-padded taps/cols)
    wc = jnp.zeros((kmax * E, nf_pad), jnp.float32)
    bc = jnp.zeros((1, nf_pad), jnp.float32)
    lim = jnp.zeros((1, nf_pad), jnp.int32)
    for i, (w, b) in enumerate(zip(conv_ws, conv_bs)):
        k = int(w.shape[0])
        wc = wc.at[:k * E, i * F:(i + 1) * F].set(w.reshape(k * E, F))
        bc = bc.at[:, i * F:(i + 1) * F].set(b)
        lim = lim.at[:, i * F:(i + 1) * F].set(S - k + 1)                # valid conv length
    wc = wc.astype(jnp.bfloat16)

    fcw = jnp.zeros((nf_pad, c_pad), jnp.float32).at[:nk * F, :C].set(fc_w).astype(jnp.bfloat16)
    fcb = jnp.zeros((1, c_pad), jnp.float32).at[:, :C].set(fc_b)

    out = pl.pallas_call(
        functools.partial(textcnn_kernel, kmax=kmax, l_pad=l_pad),
        out_shape=jax.ShapeDtypeStruct((b_pad, c_pad), jnp.float32),
        grid=(b_pad // tb,),
        in_specs=[
            pl.BlockSpec((tb, s_pad, E), lambda bb: (bb, 0, 0)),
            pl.BlockSpec((kmax * E, nf_pad), lambda bb: (0, 0)),
            pl.BlockSpec((1, nf_pad), lambda bb: (0, 0)),
            pl.BlockSpec((1, nf_pad), lambda bb: (0, 0)),
            pl.BlockSpec((nf_pad, c_pad), lambda bb: (0, 0)),
            pl.BlockSpec((1, c_pad), lambda bb: (0, 0)),
        ],
        out_specs=pl.BlockSpec((tb, c_pad), lambda bb: (bb, 0)),
        compiler_params=pltpu.CompilerParams(
            dimension_semantics=("parallel",)),                          # 2 TCs on v7x
    )(emb, wc, bc, lim, fcw, fcb)

    return out[:B, :C]


def textcnn_reference(x, params):
    """Pure-JAX f32 reference matching the PyTorch module."""
    ids = x[0]
    emb = jnp.take(params["embedding"], ids, axis=0)     # (B, S, E)
    feats = []
    for w, b in zip(params["conv_ws"], params["conv_bs"]):
        k = int(w.shape[0])
        L = emb.shape[1] - k + 1
        conv = jnp.zeros((emb.shape[0], L, w.shape[2]), jnp.float32) + b[None]
        for j in range(k):
            conv = conv + jnp.einsum('bse,ef->bsf', emb[:, j:j + L, :], w[j])
        conv = jnp.maximum(conv, 0.0)
        feats.append(jnp.max(conv, axis=1))
    feat = jnp.concatenate(feats, axis=1)
    return feat @ params["fc_w"] + params["fc_b"]


def init_params(key, *, n_vocab, embed, num_filters, filter_sizes, num_classes):
    keys = jax.random.split(key, 3 + 2 * len(filter_sizes))
    # embedding with padding_idx = n_vocab - 1 (zero row), like nn.Embedding
    emb_table = jax.random.normal(keys[0], (n_vocab, embed), jnp.float32) * 0.1
    emb_table = emb_table.at[n_vocab - 1].set(0.0)

    conv_ws, conv_bs = [], []
    for i, k in enumerate(filter_sizes):
        # torch Conv2d weight is (F, 1, k, E); stored here as (k, E, F)
        w = jax.random.normal(keys[1 + 2 * i], (k, embed, num_filters), jnp.float32) * 0.05
        b = jax.random.normal(keys[2 + 2 * i], (1, num_filters), jnp.float32) * 0.05
        conv_ws.append(w)
        conv_bs.append(b)

    fc_in = num_filters * len(filter_sizes)
    fc_w = jax.random.normal(keys[-2], (fc_in, num_classes), jnp.float32) * 0.05
    fc_b = jax.random.normal(keys[-1], (1, num_classes), jnp.float32) * 0.05

    return {"embedding": emb_table, "conv_ws": conv_ws, "conv_bs": conv_bs,
            "fc_w": fc_w, "fc_b": fc_b}


if __name__ == "__main__":
    n_vocab = 50
    embed = 32
    seq_len = 16
    num_filters = 8
    filter_sizes = (2, 3, 4)
    num_classes = 4
    batch = 16           # small, but exercises a 2-step batch grid with TB=8

    key = jax.random.PRNGKey(0)
    pkey, ikey = jax.random.split(key)
    params = init_params(pkey, n_vocab=n_vocab, embed=embed,
                         num_filters=num_filters, filter_sizes=filter_sizes,
                         num_classes=num_classes)

    ids = jax.random.randint(ikey, (batch, seq_len), 0, n_vocab, jnp.int32)
    seq_lens = jnp.full((batch,), seq_len, jnp.int32)
    x = (ids, seq_lens)  # mirrors torch forward which uses x[0]; seq_lens unused (as in the module)

    logits = textcnn_forward(x, params)
    jax.block_until_ready(logits)
    assert logits.shape == (batch, num_classes)

    ref = textcnn_reference(x, params)
    err = float(jnp.max(jnp.abs(logits - ref)))
    assert err < 2e-2, f"max abs err vs reference: {err}"
    print("KERNEL_OK")
</pallas_src>

<mosaic_0001>
module attributes {stable_mosaic.version = 11 : i64} {
  func.func @textcnn_kernel(%arg0: i32, %arg1: memref<8x24x32xbf16, #tpu.memory_space<vmem>>, %arg2: memref<128x128xbf16, #tpu.memory_space<vmem>>, %arg3: memref<1x128xf32, #tpu.memory_space<vmem>>, %arg4: memref<1x128xi32, #tpu.memory_space<vmem>>, %arg5: memref<128x128xbf16, #tpu.memory_space<vmem>>, %arg6: memref<1x128xf32, #tpu.memory_space<vmem>>, %arg7: memref<8x128xf32, #tpu.memory_space<vmem>>) attributes {dimension_semantics = [#tpu.dimension_semantics<parallel>], iteration_bounds = array<i64: 2>, scalar_prefetch = 0 : i64, scratch_operands = 0 : i64, tpu.core_type = #tpu.core_type<tc>, window_params = [{transform_indices = @transform_0, window_bounds = array<i64: 8, 24, 32>}, {pipeline_mode = #tpu.pipeline_mode<synchronous>, transform_indices = @transform_1, window_bounds = array<i64: 128, 128>}, {pipeline_mode = #tpu.pipeline_mode<synchronous>, transform_indices = @transform_2, window_bounds = array<i64: 1, 128>}, {pipeline_mode = #tpu.pipeline_mode<synchronous>, transform_indices = @transform_3, window_bounds = array<i64: 1, 128>}, {pipeline_mode = #tpu.pipeline_mode<synchronous>, transform_indices = @transform_4, window_bounds = array<i64: 128, 128>}, {pipeline_mode = #tpu.pipeline_mode<synchronous>, transform_indices = @transform_5, window_bounds = array<i64: 1, 128>}, {transform_indices = @transform_6, window_bounds = array<i64: 8, 128>}]} {
    %c0 = arith.constant 0 : index
    %c0_0 = arith.constant 0 : index
    %c0_1 = arith.constant 0 : index
    %0 = vector.load %arg1[%c0, %c0_0, %c0_1] : memref<8x24x32xbf16, #tpu.memory_space<vmem>>, vector<8x24x32xbf16>
    %1 = vector.extract_strided_slice %0 {offsets = [0, 0, 0], sizes = [8, 16, 32], strides = [1, 1, 1]} : vector<8x24x32xbf16> to vector<8x16x32xbf16>
    %2 = vector.extract_strided_slice %0 {offsets = [0, 1, 0], sizes = [8, 16, 32], strides = [1, 1, 1]} : vector<8x24x32xbf16> to vector<8x16x32xbf16>
    %3 = vector.extract_strided_slice %0 {offsets = [0, 2, 0], sizes = [8, 16, 32], strides = [1, 1, 1]} : vector<8x24x32xbf16> to vector<8x16x32xbf16>
    %4 = vector.extract_strided_slice %0 {offsets = [0, 3, 0], sizes = [8, 16, 32], strides = [1, 1, 1]} : vector<8x24x32xbf16> to vector<8x16x32xbf16>
    %5 = tpu.concatenate %1, %2, %3, %4 in 2 : vector<8x16x32xbf16>, vector<8x16x32xbf16>, vector<8x16x32xbf16>, vector<8x16x32xbf16> -> vector<8x16x128xbf16>
    %6 = vector.shape_cast %5 : vector<8x16x128xbf16> to vector<128x128xbf16>
    %c0_2 = arith.constant 0 : index
    %c0_3 = arith.constant 0 : index
    %7 = vector.load %arg2[%c0_2, %c0_3] : memref<128x128xbf16, #tpu.memory_space<vmem>>, vector<128x128xbf16>
    %cst = arith.constant dense<0.000000e+00> : vector<128x128xf32>
    %8 = tpu.matmul %6, %7, %cst {dimension_numbers = #tpu.dot_dimension_numbers<[1], [0], [0], [1], [0, 0, 1, 1], [], []>} : vector<128x128xbf16>, vector<128x128xbf16>, vector<128x128xf32> -> vector<128x128xf32>
    %c0_4 = arith.constant 0 : index
    %c0_5 = arith.constant 0 : index
    %9 = vector.load %arg3[%c0_4, %c0_5] : memref<1x128xf32, #tpu.memory_space<vmem>>, vector<1x128xf32>
    %10 = vector.broadcast %9 : vector<1x128xf32> to vector<128x128xf32>
    %11 = arith.addf %8, %10 : vector<128x128xf32>
    %cst_6 = arith.constant 0.000000e+00 : f32
    %12 = vector.broadcast %cst_6 : f32 to vector<128x128xf32>
    %13 = arith.maximumf %11, %12 : vector<128x128xf32>
    %14 = vector.shape_cast %13 : vector<128x128xf32> to vector<8x16x128xf32>
    %15 = tpu.iota {dimensions = array<i32: 1>} : vector<8x16x128xi32>
    %c0_7 = arith.constant 0 : index
    %c0_8 = arith.constant 0 : index
    %16 = vector.load %arg4[%c0_7, %c0_8] : memref<1x128xi32, #tpu.memory_space<vmem>>, vector<1x128xi32>
    %17 = vector.shape_cast %16 : vector<1x128xi32> to vector<1x1x128xi32>
    %18 = vector.broadcast %17 : vector<1x1x128xi32> to vector<8x16x128xi32>
    %19 = arith.cmpi slt, %15, %18 : vector<8x16x128xi32>
    %cst_9 = arith.constant 0.000000e+00 : f32
    %20 = vector.broadcast %cst_9 : f32 to vector<8x16x128xf32>
    %21 = arith.select %19, %14, %20 : vector<8x16x128xi1>, vector<8x16x128xf32>
    %cst_10 = arith.constant dense<0xFF800000> : vector<8x128xf32>
    %22 = vector.multi_reduction <maximumf>, %21, %cst_10 [1] : vector<8x16x128xf32> to vector<8x128xf32>
    %23 = arith.truncf %22 : vector<8x128xf32> to vector<8x128xbf16>
    %c0_11 = arith.constant 0 : index
    %c0_12 = arith.constant 0 : index
    %24 = vector.load %arg5[%c0_11, %c0_12] : memref<128x128xbf16, #tpu.memory_space<vmem>>, vector<128x128xbf16>
    %cst_13 = arith.constant dense<0.000000e+00> : vector<8x128xf32>
    %25 = tpu.matmul %23, %24, %cst_13 {dimension_numbers = #tpu.dot_dimension_numbers<[1], [0], [0], [1], [0, 0, 1, 1], [], []>} : vector<8x128xbf16>, vector<128x128xbf16>, vector<8x128xf32> -> vector<8x128xf32>
    %c0_14 = arith.constant 0 : index
    %c0_15 = arith.constant 0 : index
    %26 = vector.load %arg6[%c0_14, %c0_15] : memref<1x128xf32, #tpu.memory_space<vmem>>, vector<1x128xf32>
    %27 = vector.broadcast %26 : vector<1x128xf32> to vector<8x128xf32>
    %28 = arith.addf %25, %27 : vector<8x128xf32>
    %c0_16 = arith.constant 0 : index
    %c0_17 = arith.constant 0 : index
    %29 = vector.load %arg7[%c0_16, %c0_17] : memref<8x128xf32, #tpu.memory_space<vmem>>, vector<8x128xf32>
    tpu.vector_store %arg7[%c0_16, %c0_17], %28 {strides = array<i32>} : memref<8x128xf32, #tpu.memory_space<vmem>>, vector<8x128xf32>,
    return
  }
  func.func @transform_0(%arg0: i32) -> (i32, i32, i32) {
    %c0_i32 = arith.constant 0 : i32
    %c0_i32_0 = arith.constant 0 : i32
    %c0_i32_1 = arith.constant 0 : i32
    return %arg0, %c0_i32, %c0_i32_0 : i32, i32, i32
  }
  func.func @transform_1(%arg0: i32) -> (i32, i32) {
    %c0_i32 = arith.constant 0 : i32
    %c0_i32_0 = arith.constant 0 : i32
    %c0_i32_1 = arith.constant 0 : i32
    return %c0_i32, %c0_i32_0 : i32, i32
  }
  func.func @transform_2(%arg0: i32) -> (i32, i32) {
    %c0_i32 = arith.constant 0 : i32
    %c0_i32_0 = arith.constant 0 : i32
    %c0_i32_1 = arith.constant 0 : i32
    return %c0_i32, %c0_i32_0 : i32, i32
  }
  func.func @transform_3(%arg0: i32) -> (i32, i32) {
    %c0_i32 = arith.constant 0 : i32
    %c0_i32_0 = arith.constant 0 : i32
    %c0_i32_1 = arith.constant 0 : i32
    return %c0_i32, %c0_i32_0 : i32, i32
  }
  func.func @transform_4(%arg0: i32) -> (i32, i32) {
    %c0_i32 = arith.constant 0 : i32
    %c0_i32_0 = arith.constant 0 : i32
    %c0_i32_1 = arith.constant 0 : i32
    return %c0_i32, %c0_i32_0 : i32, i32
  }
  func.func @transform_5(%arg0: i32) -> (i32, i32) {
    %c0_i32 = arith.constant 0 : i32
    %c0_i32_0 = arith.constant 0 : i32
    %c0_i32_1 = arith.constant 0 : i32
    return %c0_i32, %c0_i32_0 : i32, i32
  }
  func.func @transform_6(%arg0: i32) -> (i32, i32) {
    %c0_i32 = arith.constant 0 : i32
    %c0_i32_0 = arith.constant 0 : i32
    return %arg0, %c0_i32 : i32, i32
  }
}

</mosaic_0001>

<bundles_post_ra>
// kernel: tpu_custom_call.1
= control target key start
LH: loop header
LB: loop body
LE: loop exit
PB: predicated region body
PF: predicated region fallthrough
CT: control target
= control target key end

     0   :  { %11 = vsyncpa [#allocation3], 0  ;;  %s2077_s0 = inlined_call_operand.hbm [shape: bf16[16,24,32], index: 0, kind: input, shape index: {}]   ;;  %s2078_s1 = inlined_call_operand.hbm [shape: bf16[128,128], index: 1, kind: input, shape index: {}]   ;;  %s2079_s2 = inlined_call_operand.vmem [shape: f32[1,128], index: 2, kind: input, shape index: {}]   ;;  %s2080_s3 = inlined_call_operand.vmem [shape: s32[1,128], index: 3, kind: input, shape index: {}]   ;;  %s2081_s4 = inlined_call_operand.hbm [shape: bf16[128,128], index: 4, kind: input, shape index: {}]   ;;  %s2082_s5 = inlined_call_operand.vmem [shape: f32[1,128], index: 5, kind: input, shape index: {}]   ;;  %s2083_s6 = inlined_call_operand.hbm [shape: f32[16,128], index: 6, kind: output, shape index: {}]  }
   0x1   :  { %13 = vsyncpa [#allocation3 + $0x1], 0 }
   0x2   :  { %14 = vsyncpa [#allocation6], 0 }
   0x3   :  { %15 = vsyncpa [#allocation4], 0 }
   0x4   :  { %17 = vsyncpa [#allocation4 + $0x1], 0  ;;  %s1646_s21 = smov 0   ;;  %s1648_s22 = smov 0  }
   0x5   :  { %s1650_s23 = smov 0   ;;  %s1652_s24 = smov 0  }
   0x6 LB: > { %s1667_s25 = sadd.s32 4294967295, %s1598_s24   ;;  %s1213_s26 = sadd.s32 4294967294, %s1598_s24   ;;  %s1598_s24 = sphi %s1652_s24, %s2112_s24   ;;  %s1594_s23 = sphi %s1650_s23, %s2111_s23   ;;  %s1590_s22 = sphi %s1648_s22, %s2110_s22   ;;  %s1586_s21 = sphi %s1646_s21, %s2109_s21  }
   0x7   : > { %p43_p0 = scmp.ne.s32.totalorder %s1590_s22, %s1586_s21  ;;  %p2086_p1 = scmp.eq.s32.totalorder %s1667_s25, 0 }
   0x8   : > { %p172_p2 = scmp.eq.s32.totalorder %s1667_s25, 1  ;;  %p178_p3 = scmp.eq.s32.totalorder %s1213_s26, 1 }
   0x9   : > { %p1676_p4 = por %p2086_p1, %p43_p0  ;;  %p1214_p5 = scmp.ge.s32.totalorder %s1598_s24, 1 }
   0xa   : > { %p1681_p6 = por %p178_p3, %p43_p0  ;;  %p185_p7 = scmp.lt.s32.totalorder %s1598_s24, 3 }
   0xb   : > { %s2090_s27 = scalar_select %p1676_p4, 1, 0 }
   0xc   : > { %s2091_s28 = scalar_select %p1681_p6, 1, 0 }
   0xd   : > { %p1686_p8 = pnand %p1214_p5, %p185_p7  ;;  %s1600_s30 = smov [#allocation5]  }
   0xe   : > { %s197_s7 = sshll.u32 %s1600_s30, 4  ;;  %s1601_s9 = smov [#allocation7]   ;;  %s198_s7 = int_to_ptr.vmem [resolvable:$true] %s197_s7 }
   0xf   : > { %s2092_s29 = scalar_select %p1686_p8, 1, 0 }
  0x10   : > { %p1356_p9 = pneg %p1686_p8  ;;  %s216_s10 = sshll.u32 %s1601_s9, 4  ;;  %s217_s10 = int_to_ptr.vmem [resolvable:$true] %s216_s10 }
  0x11   : > { %s1461_s11 = scalar_lea.vmem %s198_s7, 1024  ;;  %p1469_p5 = scmp.lt.s32.totalorder %s198_s7, %s198_s7 }
  0x12   : > { %p1695_p11 = pnand %p1356_p9, %p2086_p1  ;;  %p1462_p13 = scmp.ne.s32.totalorder %s198_s7, %s1461_s11 }
  0x13   : > { %p1470_p7 = scmp.lt.s32.totalorder %s1461_s11, %s1461_s11 }
  0x14   : > { %p1452_p12 = pneg %p1695_p11 }
  0x15   : > { %p1471_p10 = por %p1470_p7, %p1469_p5 }
  0x16   : > { %p1464_p0 = pnand %p1462_p13, %p1452_p12 }
  0x18   : > { %p1465_p3 = pneg %p1464_p0 }
  0x1a   : > { %p1472_p9 = pnand %p1471_p10, %p1465_p3 }
  0x1c   : > { %1475 = shalt.err (!%p1472_p9)
}
  0x1d   : > { %s2084_s12 = smov 64   ;;  %s2085_s13 = smov 4  }
  0x1e   : > { %1359 = dma.hbm_to_vmem [thread:$0]  (!%p1695_p11), %s2078_s1, 1024, %s198_s7, [#allocation6], %s2084_s12, %s2084_s12, %s2085_s13  }
  0x1f   : > { %s1487_s16 = scalar_lea.vmem %s217_s10, 1024  ;;  %p1495_p10 = scmp.lt.s32.totalorder %s217_s10, %s217_s10 }
  0x20   : > { %p1488_p13 = scmp.ne.s32.totalorder %s217_s10, %s1487_s16  ;;  %p1496_p3 = scmp.lt.s32.totalorder %s1487_s16, %s1487_s16 }
  0x22   : > { %p1490_p0 = pnand %p1488_p13, %p1452_p12  ;;  %p1497_p7 = por %p1496_p3, %p1495_p10 }
  0x24   : > { %p1491_p5 = pneg %p1490_p0 }
  0x26   : > { %p1498_p9 = pnand %p1497_p7, %p1491_p5 }
  0x28   : > { %1501 = shalt.err (!%p1498_p9)
}
  0x29   : > { %1362 = dma.hbm_to_vmem [thread:$0]  (!%p1695_p11), %s2081_s4, 1024, %s217_s10, [#allocation6], %s2084_s12, %s2084_s12, %s2085_s13  }
  0x2a   : > { %s1724_s19 = sadd.s32 1, %s1598_s24   ;;  %s30_s20 = sadd.s32 1, %s1594_s23 }
  0x2b   : > { %s27_s26 = ssub.s32 %s1598_s24, %s1724_s19  ;;  %p37_p12 = scmp.ne.s32.totalorder %s1594_s23, %s1590_s22 }
  0x2c   : > { %p28_p13 = scmp.eq.s32.totalorder %s27_s26, 0  ;;  %p38_p0 = scmp.eq.s32.totalorder %s1598_s24, 0 }
  0x2d   : > { %p1734_p5 = por %p172_p2, %p37_p12  ;;  %p1373_p10 = scmp.lt.s32.totalorder %s1598_s24, 2 }
  0x2e   : > { %s1740_s7 = scalar_select %p28_p13, %s1594_s23, %s30_s20  }
  0x2f   : > { %s2094_s30 = scalar_select %p1734_p5, 1, 0 }
  0x30   : > { %p39_p3 = por %p38_p0, %p37_p12  ;;  %s233_s8 = sand.u32 1, %s1594_s23  }
  0x31   : > { %s1341_s9 = smul.u32 96, %s233_s8  ;;  %s1755_s20 = scalar_lea.sflag [#allocation3], %s233_s8 }
  0x32   : > { %s1342_s10 = smul.u32 1536, %s1598_s24  ;;  %p1744_p11 = pnand %p1373_p10, %p39_p3 }
  0x33   : > { %s237_s17 = scalar_lea.vmem [#allocation2], %s1341_s9 }
  0x34   : > { %s1751_s16 = scalar_lea.hbm %s2077_s0, %s1342_s10  ;;  %s245_s18 = sshll.u32 %s237_s17, 4  ;;  %s1753_s18 = int_to_ptr.vmem [resolvable:$true] %s245_s18 }
  0x35   : > { %s1502_s26 = scalar_lea.hbm %s1751_s16, 1536  ;;  %p1504_p7 = pneg %p1744_p11 }
  0x36   : > { %p1503_p2 = scmp.ne.s32.totalorder %s1751_s16, %s1502_s26  ;;  %s1507_s10 = scalar_lea.hbm %s2077_s0, 3072 }
  0x37   : > { %p1508_p13 = scmp.lt.s32.totalorder %s1751_s16, %s2077_s0  ;;  %p1509_p0 = scmp.lt.s32.totalorder %s1507_s10, %s1502_s26 }
  0x38   : > { %p1505_p9 = pnand %p1504_p7, %p1503_p2 }
  0x39   : > { %p1510_p10 = por %p1509_p0, %p1508_p13 }
  0x3a   : > { %p1506_p12 = pneg %p1505_p9 }
  0x3c   : > { %p1511_p3 = pnand %p1510_p10, %p1506_p12 }
  0x3e   : > { %1514 = shalt.err (!%p1511_p3)
}
  0x3f   : > { %s1515_s8 = scalar_lea.vmem %s1753_s18, 1536  ;;  %s1604_s9 = smov [#allocation2]  }
  0x40   : > { %p1516_p1 = scmp.ne.s32.totalorder %s1753_s18, %s1515_s8  ;;  %s1520_s17 = sshll.u32 %s1604_s9, 4  ;;  %s1521_s17 = int_to_ptr.vmem [resolvable:$false] %s1520_s17 }
  0x41   : > { %s1522_s12 = scalar_lea.vmem %s1521_s17, 3072  ;;  %p1523_p9 = scmp.lt.s32.totalorder %s1753_s18, %s1521_s17 }
  0x42   : > { %p1518_p6 = pnand %p1516_p1, %p1504_p7  ;;  %p1524_p5 = scmp.lt.s32.totalorder %s1522_s12, %s1515_s8 }
  0x44   : > { %p1519_p2 = pneg %p1518_p6  ;;  %p1525_p4 = por %p1524_p5, %p1523_p9 }
  0x46   : > { %p1526_p8 = pnand %p1525_p4, %p1519_p2 }
  0x48   : > { %1529 = shalt.err (!%p1526_p8)
}
  0x49   : > { %s2096_s13 = smov 4   ;;  %s2097_s26 = smov 64  }
  0x4a   : > { %1366 = dma.hbm_to_vmem [thread:$0]  (!%p1744_p11), %s1751_s16, 1536, %s1753_s18, %s1755_s20, %s2097_s26, %s2097_s26, %s2096_s13  }
  0x4b   : > { %p2098_p1 = scmp.ne.s32.totalorder %s2092_s29, 0 }
  0x4c   : > { %s1782_s14 = sand.u32 (!%p2098_p1), 1, %s1590_s22   ;;  %p2099_p4 = scmp.ne.s32.totalorder (!%p2098_p1), %s2090_s27, 0 }
  0x4d   : > { %257 = sbr.rel (%p2098_p1) target bundleno = 688 (0x2b0), region = 44  ;;  %s260_s15 = scalar_lea.sflag (!%p2098_p1), [#allocation3], %s1782_s14 }
  0x4e   : > { %s1343_s10 = smul.u32 (!%p2098_p1), 96, %s1782_s14 }
  0x50   : > { %s1786_s8 = scalar_lea.vmem (!%p2098_p1), [#allocation2], %s1343_s10 }
  0x52   : > { %1573 = dma.done.wait (%p2099_p4), %s260_s15, 1536  }
  0x53   : > { %1575 = vsyncadd (%p2099_p4), %s260_s15, 4294965760  ;;  %p2100_p6 = scmp.eq.s32.totalorder %s1667_s25, 0 }
  0x55   : > { %1577 = dma.done.wait (%p2100_p6), [#allocation6], 2048   ;;  %p2101_p8 = pmov %p2100_p6 }
  0x56   : > { %vm503_vm0 = vcmask 1046528   ;;  %vm390_vm1 = vsmask.f32 7424  ;;  %v1797_v0 = vld [vmem:[%s1786_s8 + $0x18] sm:$0xff]   ;;  %v1800_v1 = vld [vmem:[%s1786_s8 + $0x20] ss:$0 sps:$4 sm:$0xff]  }
  0x57   : > { %1579 = vsyncadd (%p2101_p8), [#allocation6], 4294965248  ;;  %v1803_v2 = vld [vmem:[%s1786_s8] sm:$0xff]   ;;  %v510_v3 = vrot.slane %v1797_v0, 1  ;;  %v511_v4 = vrot.slane %v1800_v1, 1  ;;  %v1810_v7 = vld [vmem:[%s1786_s8 + $0xc] sm:$0xff]  }
  0x58   : > { %v1421_v5 = vld [vmem:[%s1786_s8 + $0x8] ss:$0 sps:$4 sm:$0xff]   ;;  %v504_v6 = vrot.slane %v1803_v2, 1  ;;  %v1423_v10 = vld [vmem:[%s1786_s8 + $0x14] ss:$0 sps:$4 sm:$0xff]   ;;  %v392_v11 = vshrl.u32 %v1803_v2, 16 }
  0x59   : > { %v512_v8 = vsel %vm503_vm0, %v510_v3, %v511_v4  ;;  %v505_v9 = vrot.slane %v1421_v5, 1  ;;  %v394_v12 = vshll.u32 %v1803_v2, 16  ;;  %v1817_v13 = vld [vmem:[%s1786_s8 + $0x24] sm:$0xff]   ;;  %vm544_vm2 = vsmask.f32 6400  ;;  %s1605_s27 = smov 64  }
  0x5a   : > { %532 = vrot.lane.b32.xlu0 %v512_v8, %s1605_s27  ;;  %v507_v14 = vrot.slane %v1810_v7, 1  ;;  %v399_v15 = vshll.u32 %v1421_v5, 16  ;;  %v508_v17 = vrot.slane %v1423_v10, 1  ;;  %v1823_v19 = vld [vmem:[%s1786_s8 + $0x2c] ss:$0 sps:$4 sm:$0xff]   ;;  %v513_v21 = vrot.slane %v1817_v13, 1 }
  0x5b   : > { %v506_v16 = vsel %vm503_vm0, %v504_v6, %v505_v9  ;;  %v396_v18 = vrot.slane %v394_v12, 1  ;;  %v404_v22 = vshrl.u32 %v1810_v7, 16  ;;  %v406_v23 = vshll.u32 %v1810_v7, 16  ;;  %s1606_s29 = smov 32   ;;  %v1846_v56 = vld [vmem:[%s1786_s8 + $0x3c] sm:$0xff]   ;;  %v1435_v6 = vld [vmem:[#allocation5 + $0x30] sm:$0xff]  }
  0x5c   : > { %528 = vrot.lane.b32.xlu1 %v506_v16, %s1605_s27  ;;  %v401_v20 = vrot.slane %v399_v15, 1  ;;  %v509_v24 = vsel %vm503_vm0, %v507_v14, %v508_v17  ;;  %v514_v26 = vrot.slane %v1823_v19, 1  ;;  %v411_v27 = vshll.u32 %v1423_v10, 16  ;;  %v1849_v57 = vld [vmem:[%s1786_s8 + $0x44] ss:$0 sps:$4 sm:$0xff]   ;;  %v1434_v62 = vld [vmem:[#allocation5 + $0x38] sm:$0xff]  }
  0x5d   : > { %v397_v25 = vor.u32 %v396_v18, %v392_v11  ;;  %v408_v28 = vrot.slane %v406_v23, 1  ;;  %v554_v29 = vrot.slane %v404_v22, 1  ;;  %v555_v30 = vrot.slane %v406_v23, 2  ;;  %v1857_v14 = vld [vmem:[%s1786_s8 + $0x38] ss:$0 sps:$4 sm:$0xff]   ;;  %1289 = vmatprep.subr.bf16.mxu0 %v1434_v62  ;;  %s1607_s11 = smov 96  }
  0x5e   : > { %v557_v31 = vshrl.u32 %v1423_v10, 16  ;;  %v515_v33 = vsel %vm503_vm0, %v513_v21, %v514_v26  ;;  %v413_v34 = vrot.slane %v411_v27, 1  ;;  %v560_v35 = vrot.slane %v411_v27, 2  ;;  %1290 = vmatpush3.bf16.msra.mxu0 %v1434_v62  ;;  %v1436_v23 = vld [vmem:[#allocation5 + $0x28] sm:$0xff]   ;;  %s1224_s17 = sshll.u32 %s1782_s14, 3  ;;  %s1261_s26 = sshll.u32 %s1667_s25, 7 }
  0x5f   : > { %v402_v32 = vsel %vm390_vm1, %v397_v25, %v401_v20  ;;  %v409_v36 = vor.u32 %v408_v28, %v404_v22  ;;  %v556_v37 = vor.u32 %v555_v30, %v554_v29  ;;  %v545_v39 = vrot.slane %v392_v11, 1  ;;  %1291 = vmatprep.subr.bf16.mxu0 %v1435_v6  ;;  %s299_s10 = scalar_lea.vmem [#allocation8], %s1224_s17  ;;  %p2106_p11 = scmp.ne.s32.totalorder %s2094_s30, 0 }
  0x60   : > { %530 = vrot.lane.b32.xlu1 %v509_v24, %s1605_s27  ;;  %487 = vrot.lane.b32.xlu0 %v402_v32, %s1606_s29  ;;  %v559_v38 = vrot.slane %v557_v31, 1  ;;  %v546_v40 = vrot.slane %v394_v12, 2  ;;  %v548_v41 = vshrl.u32 %v1421_v5, 16  ;;  %v551_v42 = vrot.slane %v399_v15, 2  ;;  %v1854_v12 = vld [vmem:[%s1786_s8 + $0x30] sm:$0xff]   ;;  %s1124_s15 = sshll.u32 %s299_s10, 4  ;;  %s2036_s15 = int_to_ptr.vmem [resolvable:$true] %s1124_s15 }
  0x61   : > { %v428_v43 = vshrl.u32 %v1817_v13, 16  ;;  %v414_v44 = vsel %vm390_vm1, %v409_v36, %v413_v34  ;;  %v430_v46 = vshll.u32 %v1817_v13, 16  ;;  %v435_v47 = vshll.u32 %v1823_v19, 16  ;;  %s1530_s16 = scalar_lea.vmem %s2036_s15, 128  ;;  %s1610_s25 = smov [#allocation8]  }
  0x62   : > { %v561_v45 = vor.u32 %v560_v35, %v559_v38  ;;  %v547_v48 = vor.u32 %v546_v40, %v545_v39  ;;  %v550_v49 = vrot.slane %v548_v41, 1  ;;  %v416_v50 = vshrl.u32 %v1797_v0, 16  ;;  %v1877_v38 = vld [vmem:[%s1786_s8 + $0x5c] ss:$0 sps:$4 sm:$0xff]   ;;  %1292 = vmatpush3.bf16.msra.mxu0 %v1435_v6  ;;  %p1531_p5 = scmp.ne.s32.totalorder %s2036_s15, %s1530_s16  ;;  %s1534_s18 = sshll.u32 %s1610_s25, 4  ;;  %s1535_s18 = int_to_ptr.vmem [resolvable:$false] %s1534_s18 }
  0x63   : > { %v418_v51 = vshll.u32 %v1797_v0, 16  ;;  %v432_v53 = vrot.slane %v430_v46, 1  ;;  %v437_v54 = vrot.slane %v435_v47, 1  ;;  %v423_v55 = vshll.u32 %v1800_v1, 16  ;;  %1293 = vmatprep.subr.bf16.mxu0 %v1436_v23  ;;  %s1536_s20 = scalar_lea.vmem %s1535_s18, 256  ;;  %p1537_p13 = scmp.lt.s32.totalorder %s2036_s15, %s1535_s18 }
  0x64   : > { %534 = vrot.lane.b32.xlu1 %v515_v33, %s1605_s27  ;;  %489 = vrot.lane.b32.xlu0 %v414_v44, %s1606_s29  ;;  %v562_v52 = vsel %vm544_vm2, %v556_v37, %v561_v45  ;;  %v552_v58 = vor.u32 %v551_v42, %v550_v49  ;;  %v572_v60 = vrot.slane %v428_v43, 1  ;;  %v573_v61 = vrot.slane %v430_v46, 2  ;;  %v1874_v37 = vld [vmem:[%s1786_s8 + $0x54] sm:$0xff]   ;;  %v1887_v44 = vld [vmem:[%s1786_s8 + $0x50] ss:$0 sps:$4 sm:$0xff]   ;;  %v1437_v45 = vld [vmem:[#allocation5 + $0x20] sm:$0xff]   ;;  %p1532_p7 = pnand %p1531_p5, %p2106_p11  ;;  %p1538_p0 = scmp.lt.s32.totalorder %s1536_s20, %s1530_s16 }
  0x65   : > { %v420_v59 = vrot.slane %v418_v51, 1  ;;  %v433_v63 = vor.u32 %v432_v53, %v428_v43  ;;  %v425_v3 = vrot.slane %v423_v55, 1  ;;  %v575_v4 = vshrl.u32 %v1823_v19, 16  ;;  %v1884_v43 = vld [vmem:[%s1786_s8 + $0x48] sm:$0xff]  }
  0x66   : > { %v578_v5 = vrot.slane %v435_v47, 2  ;;  %v553_v8 = vsel %vm544_vm2, %v547_v48, %v552_v58  ;;  %v574_v10 = vor.u32 %v573_v61, %v572_v60  ;;  %v563_v11 = vrot.slane %v416_v50, 1  ;;  %1294 = vmatpush3.bf16.msra.mxu0 %v1436_v23  ;;  %p1533_p12 = pneg %p1532_p7  ;;  %p1539_p10 = por %p1538_p0, %p1537_p13 }
  0x67   : > { %v421_v9 = vor.u32 %v420_v59, %v416_v50  ;;  %v438_v15 = vsel %vm390_vm1, %v433_v63, %v437_v54  ;;  %v577_v16 = vrot.slane %v575_v4, 1  ;;  %v564_v17 = vrot.slane %v418_v51, 2  ;;  %1295 = vmatprep.subr.bf16.mxu0 %v1437_v45  ;;  %v1438_v63 = vld [vmem:[#allocation5 + $0x18] sm:$0xff]  }
  0x68   : > { %619 = vrot.lane.b32.xlu1 %v562_v52, %s1607_s11  ;;  %617 = vrot.lane.b32.xlu0 %v553_v8, %s1607_s11  ;;  %v566_v18 = vshrl.u32 %v1800_v1, 16  ;;  %v569_v20 = vrot.slane %v423_v55, 2  ;;  %v452_v21 = vshrl.u32 %v1846_v56, 16  ;;  %v454_v22 = vshll.u32 %v1846_v56, 16  ;;  %p1540_p3 = pnand %p1539_p10, %p1533_p12 }
  0x69   : > { %v426_v19 = vsel %vm390_vm1, %v421_v9, %v425_v3  ;;  %v579_v24 = vor.u32 %v578_v5, %v577_v16  ;;  %v565_v25 = vor.u32 %v564_v17, %v563_v11  ;;  %v459_v27 = vshll.u32 %v1849_v57, 16 }
  0x6a   : > { %v568_v26 = vrot.slane %v566_v18, 1  ;;  %v456_v28 = vrot.slane %v454_v22, 1  ;;  %v440_v1 = vshrl.u32 %v1854_v12, 16  ;;  %v442_v29 = vshll.u32 %v1854_v12, 16  ;;  %1296 = vmatpush3.bf16.msra.mxu0 %v1437_v45  ;;  %v1439_v18 = vld [vmem:[#allocation5 + $0x10] sm:$0xff]  }
  0x6b   : > { %v447_v30 = vshll.u32 %v1857_v14, 16  ;;  %v580_v31 = vsel %vm544_vm2, %v574_v10, %v579_v24  ;;  %v461_v34 = vrot.slane %v459_v27, 1  ;;  %v519_v40 = vrot.slane %v1846_v56, 1  ;;  %1297 = vmatprep.subr.bf16.mxu0 %v1438_v63 }
  0x6c   : > { %493 = vrot.lane.b32.xlu1 %v438_v15, %s1606_s29  ;;  %491 = vrot.lane.b32.xlu0 %v426_v19, %s1606_s29  ;;  %v570_v32 = vor.u32 %v569_v20, %v568_v26  ;;  %v457_v33 = vor.u32 %v456_v28, %v452_v21  ;;  %v444_v35 = vrot.slane %v442_v29, 1  ;;  %v520_v41 = vrot.slane %v1849_v57, 1 }
  0x6d   : > { %v449_v36 = vrot.slane %v447_v30, 1  ;;  %v516_v42 = vrot.slane %v1854_v12, 1  ;;  %v590_v47 = vrot.slane %v452_v21, 1  ;;  %v591_v48 = vrot.slane %v454_v22, 2 }
  0x6e   : > { %v571_v39 = vsel %vm544_vm2, %v565_v25, %v570_v32  ;;  %v445_v46 = vor.u32 %v444_v35, %v440_v1  ;;  %v517_v49 = vrot.slane %v1857_v14, 1  ;;  %v593_v50 = vshrl.u32 %v1849_v57, 16  ;;  %1298 = vmatpush3.bf16.msra.mxu0 %v1438_v63 }
  0x6f   : > { %v596_v51 = vrot.slane %v459_v27, 2  ;;  %v581_v52 = vrot.slane %v440_v1, 1  ;;  %v462_v53 = vsel %vm390_vm1, %v457_v33, %v461_v34  ;;  %v582_v55 = vrot.slane %v442_v29, 2  ;;  %v1440_v1 = vld [vmem:[#allocation5 + $0x8] sm:$0xff]   ;;  %1299 = vmatprep.subr.bf16.mxu0 %v1439_v18 }
  0x70   : > { %623 = vrot.lane.b32.xlu1 %v580_v31, %s1607_s11  ;;  %621 = vrot.lane.b32.xlu0 %v571_v39, %s1607_s11  ;;  %v450_v54 = vsel %vm390_vm1, %v445_v46, %v449_v36  ;;  %v584_v58 = vshrl.u32 %v1857_v14, 16  ;;  %v521_v59 = vsel %vm503_vm0, %v519_v40, %v520_v41  ;;  %v595_v60 = vrot.slane %v593_v50, 1 }
  0x71   : > { %v587_v61 = vrot.slane %v447_v30, 2  ;;  %v478_v62 = vshll.u32 %v1874_v37, 16  ;;  %v592_v3 = vor.u32 %v591_v48, %v590_v47  ;;  %v476_v4 = vshrl.u32 %v1874_v37, 16 }
  0x72   : > { %v586_v57 = vrot.slane %v584_v58, 1  ;;  %v483_v5 = vshll.u32 %v1877_v38, 16  ;;  %v597_v6 = vor.u32 %v596_v51, %v595_v60  ;;  %v466_v9 = vshll.u32 %v1884_v43, 16  ;;  %1300 = vmatpush3.bf16.msra.mxu0 %v1439_v18 }
  0x73   : > { %v480_v8 = vrot.slane %v478_v62, 1  ;;  %v471_v10 = vshll.u32 %v1887_v44, 16  ;;  %v518_v11 = vsel %vm503_vm0, %v516_v42, %v517_v49  ;;  %v583_v14 = vor.u32 %v582_v55, %v581_v52  ;;  %1301 = vmatprep.subr.bf16.mxu0 %v1440_v1  ;;  %v1441_v42 = vld [vmem:[#allocation5] sm:$0xff]  }
  0x74   : > { %497 = vrot.lane.b32.xlu1 %v462_v53, %s1606_s29  ;;  %495 = vrot.lane.b32.xlu0 %v450_v54, %s1606_s29  ;;  %v588_v15 = vor.u32 %v587_v61, %v586_v57  ;;  %v464_v16 = vshrl.u32 %v1884_v43, 16  ;;  %v468_v17 = vrot.slane %v466_v9, 1  ;;  %v485_v19 = vrot.slane %v483_v5, 1 }
  0x75   : > { %v525_v20 = vrot.slane %v1874_v37, 1  ;;  %v598_v21 = vsel %vm544_vm2, %v592_v3, %v597_v6  ;;  %v481_v22 = vor.u32 %v480_v8, %v476_v4  ;;  %v473_v23 = vrot.slane %v471_v10, 1 }
  0x76   : > { %v526_v24 = vrot.slane %v1877_v38, 1  ;;  %v589_v25 = vsel %vm544_vm2, %v583_v14, %v588_v15  ;;  %v469_v26 = vor.u32 %v468_v17, %v464_v16  ;;  %v522_v27 = vrot.slane %v1884_v43, 1  ;;  %1302 = vmatpush3.bf16.msra.mxu0 %v1440_v1 }
  0x77   : > { %v611_v28 = vshrl.u32 %v1877_v38, 16  ;;  %v523_v29 = vrot.slane %v1887_v44, 1  ;;  %v602_v30 = vshrl.u32 %v1887_v44, 16  ;;  %v608_v31 = vrot.slane %v476_v4, 1  ;;  %1303 = vmatprep.subr.bf16.mxu0 %v1441_v42 }
  0x78   : > { %538 = vrot.lane.b32.xlu1 %v521_v59, %s1605_s27  ;;  %536 = vrot.lane.b32.xlu0 %v518_v11, %s1605_s27  ;;  %v609_v32 = vrot.slane %v478_v62, 2  ;;  %v614_v33 = vrot.slane %v483_v5, 2  ;;  %v599_v34 = vrot.slane %v464_v16, 1  ;;  %v600_v36 = vrot.slane %v466_v9, 2 }
  0x79   : > { %v613_v35 = vrot.slane %v611_v28, 1  ;;  %v486_v39 = vsel %vm390_vm1, %v481_v22, %v485_v19  ;;  %v474_v38 = vsel %vm390_vm1, %v469_v26, %v473_v23  ;;  %v604_v40 = vrot.slane %v602_v30, 1 }
  0x7a   : > { %v605_v41 = vrot.slane %v471_v10, 2  ;;  %v527_v44 = vsel %vm503_vm0, %v525_v20, %v526_v24  ;;  %v524_v45 = vsel %vm503_vm0, %v522_v27, %v523_v29  ;;  %v610_v46 = vor.u32 %v609_v32, %v608_v31  ;;  %1304 = vmatpush3.bf16.msra.mxu0 %v1441_v42  ;;  %v1448_v42 = vld [vmem:[#allocation7 + $0x8] sm:$0xff]  }
  0x7b   : > { %v615_v47 = vor.u32 %v614_v33, %v613_v35  ;;  %v601_v48 = vor.u32 %v600_v36, %v599_v34  ;;  %vm633_vm3 = vcmask 261120   ;;  %vm650_vm4 = vcmask 523264   ;;  %v1442_v36 = vld [vmem:[#allocation7 + $0x38] sm:$0xff]  }
  0x7c   : > { %627 = vrot.lane.b32.xlu1 %v598_v21, %s1607_s11  ;;  %625 = vrot.lane.b32.xlu0 %v589_v25, %s1607_s11  ;;  %v606_v49 = vor.u32 %v605_v41, %v604_v40  ;;  %vm667_vm5 = vcmask 785408   ;;  %v1446_v40 = vld [vmem:[#allocation7 + $0x18] sm:$0xff]   ;;  %v1447_v41 = vld [vmem:[#allocation7 + $0x10] sm:$0xff]   ;;  %vm1609_vm6 = vmmov 0   ;;  %vm1005_vm9 = vcmask 1041409  }
  0x7d   : > { %v616_v50 = vsel %vm544_vm2, %v610_v46, %v615_v47  ;;  %v876_v46 = vlaneseq  ;;  %vm1007_vm10 = vcmask 1042434   ;;  %vm1009_vm11 = vcmask 1043459  }
  0x7e   : > { %v607_v51 = vsel %vm544_vm2, %v601_v48, %v606_v49  ;;  %v1965_v49 = vld [vmem:[%s2079_s2] ss:$0 sm:$0xff]  ;;  %vm1011_vm12 = vcmask 1044484   ;;  %vm1013_vm13 = vcmask 1045509   ;;  %vm1015_vm14 = vcmask 1046534  }
  0x7f   : > { %vm1017_vm15 = vcmask 1047559  }
  0x80   : > { %501 = vrot.lane.b32.xlu1 %v486_v39, %s1606_s29  ;;  %499 = vrot.lane.b32.xlu0 %v474_v38, %s1606_s29  ;;  %v1608_v39 = vmov 0.0   ;;  %v1445_v38 = vld [vmem:[#allocation7 + $0x20] sm:$0xff]   ;;  %s2034_s29 = scalar_lea.hbm %s2083_s6, %s1261_s26 }
  0x81   : > { %1321 = vmatprep.subr.bf16.mxu1 %v1608_v39  ;;  %1337 = vmatprep.mubr.msk.bf16.mxu1 %vm1609_vm6, %v1608_v39 }
  0x82   : > { %1322 = vmatpush3.bf16.msra.mxu1 %v1442_v36 }
  0x83   : > { %1323 = vmatprep.subr.bf16.mxu1 %v1608_v39 }
  0x84   : > { %542 = vrot.lane.b32.xlu1 %v527_v44, %s1605_s27  ;;  %540 = vrot.lane.b32.xlu0 %v524_v45, %s1605_s27  ;;  %v1449_v44 = vld [vmem:[#allocation7] sm:$0xff]  }
  0x88   : > { %631 = vrot.lane.b32.xlu1 %v616_v50, %s1607_s11  ;;  %629 = vrot.lane.b32.xlu0 %v607_v51, %s1607_s11  ;;  %v877_v50 = vshrl.u32 %v876_v46, 7  ;;  %s1111_s11 = scalar_lea.sflag [#allocation4], %s1782_s14 }
  0xcc   : > { %v533_v52 = vpop.permute.xlu0 %532 }
  0xce   : > { %v529_v53 = vpop.permute.xlu1 %528 }
  0xd2   : > { %v531_v54 = vpop.permute.xlu1 %530  ;;  %v488_v55 = vpop.permute.xlu0 %487 }
  0xd3   : > { %v635_v60 = vsel %vm633_vm3, %v1803_v2, %v488_v55  ;;  %v878_v55 = vadd.s32 8, %v877_v50 }
  0xd4   : > { %v652_v3 = vsel %vm650_vm4, %v635_v60, %v529_v53 }
  0xd6   : > { %v535_v58 = vpop.permute.xlu1 %534  ;;  %v490_v59 = vpop.permute.xlu0 %489 }
  0xd7   : > { %v637_v61 = vsel %vm633_vm3, %v1810_v7, %v490_v59 }
  0xd8   : > { %v654_v57 = vsel %vm650_vm4, %v637_v61, %v531_v54 }
  0xda   : > { %v620_v62 = vpop.permute.xlu1 %619  ;;  %v618_v63 = vpop.permute.xlu0 %617 }
  0xdb   : > { %v669_v4 = vsel %vm667_vm5, %v652_v3, %v618_v63  ;;  %v672_v5 = vsel %vm667_vm5, %v654_v57, %v620_v62  ;;  %v1250_v62 = vld [vmem:[%s2080_s3] ss:$0 sm:$0xff] }
  0xdc   : > { %1305 = vmatprep.mubr.bf16.mxu0 %v669_v4  ;;  %vm1975_vm7 = vcmp.lt.s32.totalorder %v878_v55, %v1250_v62  ;;  %vm1981_vm8 = vcmp.lt.s32.totalorder %v877_v50, %v1250_v62 }
  0xdd   : > { %1306 = vmatmul.mubr.bf16.vlgmr.msra.gmra.mxu0 %v672_v5 }
  0xde   : > { %v494_v6 = vpop.permute.xlu1 %493  ;;  %v492_v8 = vpop.permute.xlu0 %491 }
  0xdf   : > { %v641_v2 = vsel %vm633_vm3, %v1817_v13, %v494_v6  ;;  %v639_v7 = vsel %vm633_vm3, %v1797_v0, %v492_v8 }
  0xe0   : > { %v656_v11 = vsel %vm650_vm4, %v639_v7, %v533_v52  ;;  %v658_v14 = vsel %vm650_vm4, %v641_v2, %v535_v58 }
  0xe2   : > { %v624_v9 = vpop.permute.xlu1 %623  ;;  %v622_v10 = vpop.permute.xlu0 %621 }
  0xe3   : > { %v675_v15 = vsel %vm667_vm5, %v656_v11, %v622_v10  ;;  %v678_v16 = vsel %vm667_vm5, %v658_v14, %v624_v9 }
  0xe4   : > { %1309 = vmatprep.mubr.bf16.mxu0 %v675_v15 }
  0xe5   : > { %1310 = vmatmul.mubr.bf16.gmra.mxu0 %v678_v16 }
  0xe6   : > { %v498_v17 = vpop.permute.xlu1 %497  ;;  %v496_v18 = vpop.permute.xlu0 %495 }
  0xe7   : > { %v645_v13 = vsel %vm633_vm3, %v1846_v56, %v498_v17  ;;  %v643_v0 = vsel %vm633_vm3, %v1854_v12, %v496_v18 }
  0xea   : > { %v539_v19 = vpop.permute.xlu1 %538  ;;  %v537_v20 = vpop.permute.xlu0 %536 }
  0xeb   : > { %v662_v21 = vsel %vm650_vm4, %v645_v13, %v539_v19  ;;  %v660_v22 = vsel %vm650_vm4, %v643_v0, %v537_v20 }
  0xee   : > { %v628_v23 = vpop.permute.xlu1 %627  ;;  %v626_v24 = vpop.permute.xlu0 %625 }
  0xef   : > { %v681_v25 = vsel %vm667_vm5, %v660_v22, %v626_v24  ;;  %v684_v26 = vsel %vm667_vm5, %v662_v21, %v628_v23 }
  0xf0   : > { %1313 = vmatprep.mubr.bf16.mxu0 %v681_v25 }
  0xf1   : > { %1314 = vmatmul.mubr.bf16.gmra.mxu0 %v684_v26 }
  0xf2   : > { %v502_v27 = vpop.permute.xlu1 %501  ;;  %v500_v28 = vpop.permute.xlu0 %499 }
  0xf3   : > { %v649_v56 = vsel %vm633_vm3, %v1874_v37, %v502_v27  ;;  %v647_v12 = vsel %vm633_vm3, %v1884_v43, %v500_v28  ;;  %v1443_v37 = vld [vmem:[#allocation7 + $0x30] sm:$0xff]   ;;  %v1444_v43 = vld [vmem:[#allocation7 + $0x28] sm:$0xff]  }
  0xf4   : > { %1324 = vmatpush3.bf16.msra.mxu1 %v1443_v37 }
  0xf5   : > { %1325 = vmatprep.subr.bf16.mxu1 %v1608_v39 }
  0xf6   : > { %v543_v1 = vpop.permute.xlu1 %542  ;;  %v541_v29 = vpop.permute.xlu0 %540 }
  0xf7   : > { %v666_v30 = vsel %vm650_vm4, %v649_v56, %v543_v1  ;;  %v664_v31 = vsel %vm650_vm4, %v647_v12, %v541_v29 }
  0xf8   : > { %1326 = vmatpush3.bf16.msra.mxu1 %v1444_v43 }
  0xf9   : > { %1327 = vmatprep.subr.bf16.mxu1 %v1608_v39 }
  0xfa   : > { %v632_v32 = vpop.permute.xlu1 %631  ;;  %v630_v33 = vpop.permute.xlu0 %629 }
  0xfb   : > { %v687_v34 = vsel %vm667_vm5, %v664_v31, %v630_v33  ;;  %v690_v35 = vsel %vm667_vm5, %v666_v30, %v632_v32 }
  0xfc   : > { %1317 = vmatprep.mubr.bf16.mxu0 %v687_v34  ;;  %1328 = vmatpush3.bf16.msra.mxu1 %v1445_v38 }
  0xfd   : > { %1318 = vmatmul.mubr.bf16.gmra.mxu0 %v690_v35  ;;  %1329 = vmatprep.subr.bf16.mxu1 %v1608_v39 }
 0x100   : > { %1330 = vmatpush3.bf16.msra.mxu1 %v1446_v40 }
 0x101   : > { %1331 = vmatprep.subr.bf16.mxu1 %v1608_v39 }
 0x104   : > { %1332 = vmatpush3.bf16.msra.mxu1 %v1447_v41 }
 0x105   : > { %1333 = vmatprep.subr.bf16.mxu1 %v1608_v39 }
 0x108   : > { %1334 = vmatpush3.bf16.msra.mxu1 %v1448_v42 }
 0x109   : > { %1335 = vmatprep.subr.bf16.mxu1 %v1608_v39 }
 0x10c   : > { %1336 = vmatpush3.bf16.msra.mxu1 %v1449_v44 }
 0x19d   : > { %v1307_v45 = vpop.f32.mrf.mxu0 }
 0x19e   : > { %v806_v59 = vadd.f32 %v1307_v45, %v1965_v49 }
 0x19f   : > { %v797_v47 = vpop.f32.mrf.mxu0 }
 0x1a0   : > { %v798_v54 = vadd.f32 %v1965_v49, %v797_v47  ;;  %v862_v6 = vmax.f32 %v806_v59, 0.0 }
 0x1a1   : > { %v1308_v48 = vpop.f32.mrf.mxu0 }
 0x1a2   : > { %v809_v52 = vadd.f32 %v1308_v48, %v1965_v49  ;;  %v860_v57 = vmax.f32 %v798_v54, 0.0  ;;  %v888_v18 = vsel %vm1981_vm8, %v862_v6, 0.0 }
 0x1a3   : > { %v800_v51 = vpop.f32.mrf.mxu0 }
 0x1a4   : > { %v801_v53 = vadd.f32 %v1965_v49, %v800_v51  ;;  %v863_v63 = vmax.f32 %v809_v52, 0.0  ;;  %v886_v17 = vsel %vm1981_vm8, %v860_v57, 0.0 }
 0x1a5   : > { %v1311_v58 = vpop.f32.mrf.mxu0 }
 0x1a6   : > { %v861_v60 = vmax.f32 %v801_v53, 0.0  ;;  %v822_v8 = vadd.f32 %v1311_v58, %v1965_v49  ;;  %v889_v11 = vsel %vm1975_vm7, %v863_v63, 0.0 }
 0x1a7   : > { %v813_v61 = vpop.f32.mrf.mxu0  ;;  %v909_v0 = vmax.f32 %v888_v18, %v889_v11 }
 0x1a8   : > { %v814_v3 = vadd.f32 %v1965_v49, %v813_v61  ;;  %v887_v9 = vsel %vm1975_vm7, %v861_v60, 0.0  ;;  %v866_v20 = vmax.f32 %v822_v8, 0.0 }
 0x1a9   : > { %v1312_v5 = vpop.f32.mrf.mxu0  ;;  %v902_v19 = vmax.f32 %v886_v17, %v887_v9  ;;  %v910_v1 = vrot.slane %v909_v0, 4 }
 0x1aa   : > { %v825_v2 = vadd.f32 %v1312_v5, %v1965_v49  ;;  %v864_v14 = vmax.f32 %v814_v3, 0.0  ;;  %v892_v27 = vsel %vm1981_vm8, %v866_v20, 0.0 }
 0x1ab   : > { %v816_v10 = vpop.f32.mrf.mxu0  ;;  %v903_v26 = vrot.slane %v902_v19, 4  ;;  %v911_v35 = vmax.f32 %v909_v0, %v910_v1 }
 0x1ac   : > { %v867_v15 = vmax.f32 %v825_v2, 0.0  ;;  %v817_v16 = vadd.f32 %v1965_v49, %v816_v10  ;;  %v890_v21 = vsel %vm1981_vm8, %v864_v14, 0.0 }
 0x1ad   : > { %v904_v32 = vmax.f32 %v902_v19, %v903_v26  ;;  %v912_v46 = vrot.slane %v911_v35, 2 }
 0x1ae   : > { %v865_v13 = vmax.f32 %v817_v16, 0.0  ;;  %v893_v22 = vsel %vm1975_vm7, %v867_v15, 0.0 }
 0x1af   : > { %v923_v29 = vmax.f32 %v892_v27, %v893_v22  ;;  %v905_v41 = vrot.slane %v904_v32, 2  ;;  %v913_v60 = vmax.f32 %v911_v35, %v912_v46 }
 0x1b0   : > { %v891_v23 = vsel %vm1975_vm7, %v865_v13, 0.0 }
 0x1b1   : > { %v916_v24 = vmax.f32 %v890_v21, %v891_v23  ;;  %v1315_v25 = vpop.f32.mrf.mxu0  ;;  %v924_v36 = vrot.slane %v923_v29, 4  ;;  %v906_v58 = vmax.f32 %v904_v32, %v905_v41  ;;  %v914_v11 = vrot.slane %v913_v60, 1 }
 0x1b2   : > { %v838_v28 = vadd.f32 %v1315_v25, %v1965_v49 }
 0x1b3   : > { %v917_v56 = vrot.slane %v916_v24, 4  ;;  %v829_v12 = vpop.f32.mrf.mxu0  ;;  %v925_v47 = vmax.f32 %v923_v29, %v924_v36  ;;  %v907_v2 = vrot.slane %v906_v58, 1  ;;  %v915_v25 = vmax.f32 %v913_v60, %v914_v11 }
 0x1b4   : > { %v830_v30 = vadd.f32 %v1965_v49, %v829_v12  ;;  %v870_v33 = vmax.f32 %v838_v28, 0.0 }
 0x1b5   : > { %v1316_v31 = vpop.f32.mrf.mxu0  ;;  %v918_v39 = vmax.f32 %v916_v24, %v917_v56  ;;  %v926_v61 = vrot.slane %v925_v47, 2  ;;  %v908_v21 = vmax.f32 %v906_v58, %v907_v2  ;;  %v959_v36 = vpack.c.bf16 %v915_v25, %v915_v25 }
 0x1b6   : > { %v841_v34 = vadd.f32 %v1316_v31, %v1965_v49  ;;  %v868_v43 = vmax.f32 %v830_v30, 0.0  ;;  %v896_v42 = vsel %vm1981_vm8, %v870_v33, 0.0 }
 0x1b7   : > { %v832_v37 = vpop.f32.mrf.mxu0  ;;  %v919_v48 = vrot.slane %v918_v39, 2  ;;  %v927_v14 = vmax.f32 %v925_v47, %v926_v61  ;;  %v958_v31 = vpack.c.bf16 %v908_v21, %v908_v21  ;;  %v998_v4 = vunpack.c.l.b16 %v959_v36 }
 0x1b8   : > { %v871_v38 = vmax.f32 %v841_v34, 0.0  ;;  %v833_v40 = vadd.f32 %v1965_v49, %v832_v37  ;;  %v894_v51 = vsel %vm1981_vm8, %v868_v43, 0.0 }
 0x1b9   : > { %v920_v62 = vmax.f32 %v918_v39, %v919_v48  ;;  %v928_v1 = vrot.slane %v927_v14, 1 }
 0x1ba   : > { %v897_v44 = vsel %vm1975_vm7, %v871_v38, 0.0  ;;  %v869_v45 = vmax.f32 %v833_v40, 0.0  ;;  %v997_v40 = vunpack.c.l.b16 %v958_v31 }
 0x1bb   : > { %v937_v50 = vmax.f32 %v896_v42, %v897_v44  ;;  %v921_v15 = vrot.slane %v920_v62, 1  ;;  %v929_v39 = vmax.f32 %v927_v14, %v928_v1 }
 0x1bc   : > { %v895_v52 = vsel %vm1975_vm7, %v869_v45, 0.0 }
 0x1bd   : > { %v938_v53 = vrot.slane %v937_v50, 4  ;;  %v930_v54 = vmax.f32 %v894_v51, %v895_v52  ;;  %v1319_v55 = vpop.f32.mrf.mxu0  ;;  %v922_v26 = vmax.f32 %v920_v62, %v921_v15  ;;  %v961_v45 = vpack.c.bf16 %v929_v39, %v929_v39 }
 0x1be   : > { %v854_v59 = vadd.f32 %v1319_v55, %v1965_v49 }
 0x1bf   : > { %v931_v63 = vrot.slane %v930_v54, 4  ;;  %v845_v3 = vpop.f32.mrf.mxu0  ;;  %v939_v57 = vmax.f32 %v937_v50, %v938_v53  ;;  %v960_v32 = vpack.c.bf16 %v922_v26, %v922_v26  ;;  %v1006_v50 = vsel %vm1005_vm9, %v998_v4, %v997_v40 }
 0x1c0   : > { %v846_v5 = vadd.f32 %v1965_v49, %v845_v3  ;;  %v874_v9 = vmax.f32 %v854_v59, 0.0  ;;  %v1000_v55 = vunpack.c.l.b16 %v961_v45 }
 0x1c1   : > { %v932_v6 = vmax.f32 %v930_v54, %v931_v63  ;;  %v1320_v8 = vpop.f32.mrf.mxu0  ;;  %v940_v18 = vrot.slane %v939_v57, 2  ;;  %v999_v41 = vunpack.c.l.b16 %v960_v32 }
 0x1c2   : > { %v857_v10 = vadd.f32 %v1320_v8, %v1965_v49  ;;  %v872_v19 = vmax.f32 %v846_v5, 0.0  ;;  %v900_v22 = vsel %vm1981_vm8, %v874_v9, 0.0 }
 0x1c3   : > { %v933_v16 = vrot.slane %v932_v6, 2  ;;  %v848_v17 = vpop.f32.mrf.mxu0  ;;  %v941_v29 = vmax.f32 %v939_v57, %v940_v18  ;;  %v1008_v54 = vsel %vm1007_vm10, %v999_v41, %v1006_v50 }
 0x1c4   : > { %v875_v20 = vmax.f32 %v857_v10, 0.0  ;;  %v849_v13 = vadd.f32 %v1965_v49, %v848_v17  ;;  %v898_v56 = vsel %vm1981_vm8, %v872_v19, 0.0  ;;  %v1010_v61 = vsel %vm1009_vm11, %v1000_v55, %v1008_v54  ;;  %v1251_v10 = vld [vmem:[%s2082_s5] ss:$0 sm:$0xff] }
 0x1c5   : > { %v934_v0 = vmax.f32 %v932_v6, %v933_v16  ;;  %v942_v37 = vrot.slane %v941_v29, 1 }
 0x1c6   : > { %v901_v23 = vsel %vm1975_vm7, %v875_v20, 0.0  ;;  %v873_v24 = vmax.f32 %v849_v13, 0.0 }
 0x1c7   : > { %v935_v27 = vrot.slane %v934_v0, 1  ;;  %v951_v28 = vmax.f32 %v900_v22, %v901_v23  ;;  %v943_v46 = vmax.f32 %v941_v29, %v942_v37 }
 0x1c8   : > { %v899_v49 = vsel %vm1975_vm7, %v873_v24, 0.0 }
 0x1c9   : > { %v952_v12 = vrot.slane %v951_v28, 4  ;;  %v944_v30 = vmax.f32 %v898_v56, %v899_v49  ;;  %v936_v33 = vmax.f32 %v934_v0, %v935_v27  ;;  %v963_v58 = vpack.c.bf16 %v943_v46, %v943_v46 }
 0x1cb   : > { %v953_v34 = vmax.f32 %v951_v28, %v952_v12  ;;  %v945_v35 = vrot.slane %v944_v30, 4  ;;  %v962_v7 = vpack.c.bf16 %v936_v33, %v936_v33  ;;  %v1002_v3 = vunpack.c.l.b16 %v963_v58 }
 0x1cd   : > { %v954_v43 = vrot.slane %v953_v34, 2  ;;  %v946_v38 = vmax.f32 %v944_v30, %v945_v35  ;;  %v1001_v51 = vunpack.c.l.b16 %v962_v7 }
 0x1cf   : > { %v955_v42 = vmax.f32 %v953_v34, %v954_v43  ;;  %v947_v44 = vrot.slane %v946_v38, 2  ;;  %v1012_v63 = vsel %vm1011_vm12, %v1001_v51, %v1010_v61 }
 0x1d0   : > { %v1014_v6 = vsel %vm1013_vm13, %v1002_v3, %v1012_v63 }
 0x1d1   : > { %v956_v47 = vrot.slane %v955_v42, 1  ;;  %v948_v48 = vmax.f32 %v946_v38, %v947_v44 }
 0x1d3   : > { %v949_v52 = vrot.slane %v948_v48, 1  ;;  %v957_v53 = vmax.f32 %v955_v42, %v956_v47 }
 0x1d5   : > { %v950_v59 = vmax.f32 %v948_v48, %v949_v52  ;;  %v965_v60 = vpack.c.bf16 %v957_v53, %v957_v53 }
 0x1d7   : > { %v964_v62 = vpack.c.bf16 %v950_v59, %v950_v59  ;;  %v1004_v5 = vunpack.c.l.b16 %v965_v60 }
 0x1d9   : > { %v1003_v57 = vunpack.c.l.b16 %v964_v62 }
 0x1db   : > { %v1016_v8 = vsel %vm1015_vm14, %v1003_v57, %v1014_v6 }
 0x1dc   : > { %v1018_v2 = vsel %vm1017_vm15, %v1004_v5, %v1016_v8 }
 0x1dd   : > { %v1019_v9 = vpack.c.b16 %v1018_v2, %v1018_v2 }
 0x1df   : > { %1338 = vmatmul.mubr.bf16.vlgmr.msra.gmra.mxu1 %v1019_v9 }
 0x29f   : > { %v1103_v11 = vpop.f32.mrf.mxu1 }
 0x2a0   : > { %v1104_v14 = vadd.f32 %v1251_v10, %v1103_v11 }
 0x2a1   : > { %v1339_v15 = vpop.f32.mrf.mxu1 }
 0x2a2   : > { %1109 = vst [vmem:[%s299_s10] sm:$0xff] %v1104_v14 }
 0x2a3   : > { %v1106_v16 = vpop.f32.mrf.mxu1 }
 0x2a4   : > { %1543 = shalt.err (!%p1540_p3)
}
 0x2a5   : > { %s1544_s9 = scalar_lea.hbm %s2034_s29, 128  ;;  %s1548_s12 = scalar_lea.hbm %s2083_s6, 256 }
 0x2a6   : > { %p1545_p2 = scmp.ne.s32.totalorder %s2034_s29, %s1544_s9  ;;  %p1549_p4 = scmp.lt.s32.totalorder %s2034_s29, %s2083_s6 }
 0x2a7   : > { %p1550_p6 = scmp.lt.s32.totalorder %s1548_s12, %s1544_s9 }
 0x2a8   : > { %p1546_p9 = pnand %p1545_p2, %p2106_p11 }
 0x2a9   : > { %p1551_p8 = por %p1550_p6, %p1549_p4 }
 0x2aa   : > { %p1547_p1 = pneg %p1546_p9 }
 0x2ac   : > { %p1552_p5 = pnand %p1551_p8, %p1547_p1 }
 0x2ae   : > { %1555 = shalt.err (!%p1552_p5)
}
 0x2af   : > { %1354 = dma.vmem_to_hbm [thread:$0]  (%p2106_p11), %s2036_s15, 128, %s2034_s29, %s1111_s11   ;;  %v1340_v17 = vpop.f32.mrf.mxu1 }
 0x2b0 PF: > { %s1136_s10 = sand.u32 1, %s1586_s21   ;;  %p2107_p7 = scmp.ne.s32.totalorder %s2091_s28, 0 }
 0x2b1   : > { %p2108_p12 = scmp.ge.s32.totalorder %s1598_s24, 2  ;;  %s1137_s8 = scalar_lea.sflag [#allocation4], %s1136_s10 }
 0x2b3   : > { %p1368_p13 = pnand %p2108_p12, %p2107_p7 }
 0x2b5   : > { %p1369_p0 = pneg %p1368_p13 }
 0x2b7   : > { %1581 = dma.done.wait (%p1369_p0), %s1137_s8, 128  }
 0x2b8   : > { %1583 = vsyncadd (%p1369_p0), %s1137_s8, 4294967168  ;;  %p20_p10 = scmp.ge.s32.totalorder %s1724_s19, 4   ;;  %s2109_s21 = smov %s1590_s22 }
 0x2b9   : > { %s2110_s22 = smov %s1594_s23  ;;  %s2111_s23 = smov %s1740_s7 }
 0x2ba   : > { %s2112_s24 = smov %s1724_s19  ;;  %22 = sbr.rel (!%p20_p10) target bundleno = 6 (0x6), region = 97 }
 0x2bf   :  { %1142 = vsyncpa [#allocation3], 1 }
 0x2c0   :  { %1144 = vsyncpa [#allocation3 + $0x1], 1 }
 0x2c1   :  { %1145 = vsyncpa [#allocation6], 1 }
 0x2c2   :  { %1146 = vsyncpa [#allocation4], 1 }
 0x2c3   :  { %1148 = vsyncpa [#allocation4 + $0x1], 1 }

</bundles_post_ra>
